<compile_context>
chip_gen: v6e
topology: v6e:2x2x1
jax: 0.10.0
libtpu: 0.0.40
codegen_flags: <defaults>
</compile_context>

<pallas_src>
import functools

import numpy as np
import jax
import jax.numpy as jnp
from jax.experimental import pallas as pl
from jax.experimental.pallas import tpu as pltpu

# ----------------------------------------------------------------------------
# Module configuration (small fs so the demo stays tiny; same structure and
# asserts as the torch module's __init__).  No learnable parameters.
# ----------------------------------------------------------------------------
FS = 80
SEGMENT_LENGTH_SECOND = 6.0
HOP_LENGTH_SECOND = 3.0
N_CHUNKS = 10
CHUNK_EPSILON = 1e-5
ENERGY_THRESHOLD_QUANTILE = 0.15
SEGMENT_EPSILON = 1e-3
SALIENT_PROPORTION_THRESHOLD = 0.5

SEGMENT_LENGTH = int(SEGMENT_LENGTH_SECOND * FS)   # 480
HOP_LENGTH = int(HOP_LENGTH_SECOND * FS)           # 240
CHUNK_SIZE = SEGMENT_LENGTH // N_CHUNKS            # 48
assert SEGMENT_LENGTH % N_CHUNKS == 0
assert HOP_LENGTH % CHUNK_SIZE == 0                # segments share one chunk grid
CHUNKS_PER_HOP = HOP_LENGTH // CHUNK_SIZE          # 5

# 8 chunks per packed row -> 8 * 48 = 384 lanes = 3 full 128-lane vregs.
CHUNKS_PER_ROW = 8
ROW_WIDTH = CHUNKS_PER_ROW * CHUNK_SIZE            # 384
assert ROW_WIDTH % 128 == 0


def _round_up(a, m):
    return -(-a // m) * m


# ----------------------------------------------------------------------------
# Pallas kernel: per-chunk energies of the zero-padded audio
# ----------------------------------------------------------------------------
def _chunk_energy_kernel(x_ref, energy_ref, *, n_samples):
    """x_ref:      (C, TILE_ROWS, 384) f32  lane-dense packed audio block.
    energy_ref:    (TILE_ROWS, 8)      f32  per-chunk energies (chunk = row*8+j)."""
    n_chan, tile_rows, _ = x_ref.shape
    x = x_ref[...]
    # Real audio is assumed NaN-free (padding is zeros); the isnan select just
    # keeps everything finite if that assumption is ever violated.
    xc = jnp.where(jnp.isnan(x), 0.0, x)
    sq_rows = jnp.sum(xc * xc, axis=0)                                   # (R, 384)

    jl = jax.lax.broadcasted_iota(jnp.int32, (tile_rows, CHUNKS_PER_ROW), 1)
    jr = jax.lax.broadcasted_iota(jnp.int32, (tile_rows, CHUNKS_PER_ROW), 0)

    # Grouped 48-lane reduction: one lane-slice reduction per chunk-in-row,
    # scattered into its lane with a one-hot select (no relayout/reshape).
    e = jnp.zeros((tile_rows, CHUNKS_PER_ROW), jnp.float32)
    for j in range(CHUNKS_PER_ROW):
        part = jnp.sum(sq_rows[:, j * CHUNK_SIZE:(j + 1) * CHUNK_SIZE],
                       axis=-1, keepdims=True)                           # (R, 1)
        e = e + jnp.where(jl == j, part, 0.0)
    e = e * (1.0 / float(n_chan * CHUNK_SIZE))                           # mean over (chan, chunk)

    # Chunks overlapping the padded tail: reference gives NaN energy ->
    # nan_to_num(0) -> chunk_epsilon.  Identical rule, from the static index.
    row0 = pl.program_id(0) * tile_rows
    chunk_idx = (jr + row0) * CHUNKS_PER_ROW + jl
    is_pad = (chunk_idx + 1) * CHUNK_SIZE > n_samples
    # torch: energies[energies == 0] = chunk_epsilon (one fused select)
    energy_ref[...] = jnp.where(is_pad | (e == 0.0), CHUNK_EPSILON, e)


def _pick_tile_rows(n_chan, n_rows_data, vmem_block_budget=2 * 1024 * 1024):
    """Rows per block: multiple of 8 sublanes, sized so one (double buffered)
    input block stays around the ~2 MiB sweet spot (>= ~85% of HBM roofline,
    well inside v7x's scoped VMEM), while keeping >= 2 grid steps whenever
    there is more than one block-row of data so the 'parallel' grid axis can
    use both v7x TensorCores."""
    bytes_per_row = n_chan * ROW_WIDTH * 4                    # f32, lane-dense
    by_vmem = max((vmem_block_budget // bytes_per_row) // 8 * 8, 8)
    by_split = max(_round_up(-(-n_rows_data // 2), 8), 8)
    return max(8, min(by_vmem, by_split))


def chunk_energies_pallas(x_rows, tile_rows, n_samples):
    """x_rows: (n_chan, n_rows_pad, 384) f32 zero-padded packed audio.
    Returns flat per-chunk energies (n_rows_pad * 8,), chunk = row*8 + j."""
    n_chan, n_rows_pad, row_width = x_rows.shape
    n_tiles = n_rows_pad // tile_rows
    n_elem = n_chan * n_rows_pad * row_width
    cost = pl.CostEstimate(
        flops=3 * n_elem,
        transcendentals=0,
        bytes_accessed=4 * (n_elem + n_rows_pad * CHUNKS_PER_ROW))

    energies = pl.pallas_call(
        functools.partial(_chunk_energy_kernel, n_samples=n_samples),
        out_shape=jax.ShapeDtypeStruct((n_rows_pad, CHUNKS_PER_ROW), jnp.float32),
        grid=(n_tiles,),
        in_specs=[
            pl.BlockSpec((n_chan, tile_rows, row_width), lambda i: (0, i, 0)),
        ],
        out_specs=pl.BlockSpec((tile_rows, CHUNKS_PER_ROW), lambda i: (i, 0)),
        compiler_params=pltpu.CompilerParams(
            dimension_semantics=("parallel",),
            allow_input_fusion=[True]),
        cost_estimate=cost,
    )(x_rows)
    return energies.reshape(-1)                               # flat chunk order


# ----------------------------------------------------------------------------
# Forward pass (device part): chunk energies -> threshold -> salience
# ----------------------------------------------------------------------------
def source_activity_forward(x):
    """x: (n_chan, n_samples) audio.  Returns (chunk_energies (S, 10), salient (S,))."""
    n_chan, n_samples = x.shape
    # integer ceil-div (torch uses float np.ceil), guarded for short inputs
    n_segments = max(-(-(n_samples - SEGMENT_LENGTH) // HOP_LENGTH) + 1, 1)
    total = (n_segments - 1) * HOP_LENGTH + SEGMENT_LENGTH
    n_total_chunks = total // CHUNK_SIZE
    n_rows_data = pl.cdiv(n_total_chunks, CHUNKS_PER_ROW)

    tile_rows = _pick_tile_rows(n_chan, n_rows_data)
    n_tiles = pl.cdiv(n_rows_data, tile_rows)
    n_rows_pad = n_tiles * tile_rows
    total_pad = n_rows_pad * ROW_WIDTH

    # Zero padding (== nan_to_num of the reference's NaN-padded segments);
    # padded chunks are forced to CHUNK_EPSILON inside the kernel from their
    # static chunk index, so no NaN sentinel is needed.  allow_input_fusion
    # lets XLA fuse this pad + reshape into the Pallas input DMA.
    x_pad = jnp.pad(x.astype(jnp.float32),
                    ((0, 0), (0, total_pad - n_samples)))
    x_rows = x_pad.reshape(n_chan, n_rows_pad, ROW_WIDTH)     # lane-dense packing

    energies_flat = chunk_energies_pallas(x_rows, tile_rows, n_samples)

    # (segment, chunk) -> non-overlapping global chunk index (tiny gather)
    seg_idx = (jnp.arange(n_segments)[:, None] * CHUNKS_PER_HOP
               + jnp.arange(N_CHUNKS)[None, :])               # (S, N_CHUNKS)
    chunk_energies = energies_flat[seg_idx]                   # (S, N_CHUNKS)

    thr = jnp.maximum(
        jnp.quantile(chunk_energies.reshape(-1), ENERGY_THRESHOLD_QUANTILE),
        SEGMENT_EPSILON)
    prop = jnp.mean((chunk_energies > thr).astype(jnp.float32), axis=-1)
    salient = prop > SALIENT_PROPORTION_THRESHOLD             # (S,) bool
    return chunk_energies, salient


def extract_clean_segment(x_np, i):
    """Host-side equivalent of torch.nan_to_num(segments[i]) for the save
    path: a slice of the audio, zero-padded to SEGMENT_LENGTH.  No device
    gather/transpose needed (this is what the review asked to remove)."""
    n_chan, n_samples = x_np.shape
    start = i * HOP_LENGTH
    end = min(start + SEGMENT_LENGTH, n_samples)
    seg = np.zeros((n_chan, SEGMENT_LENGTH), dtype=np.float32)
    seg[:, :end - start] = x_np[:, start:end]
    return seg


# ----------------------------------------------------------------------------
# Pure-JAX reference (mirrors the torch forward) for correctness checking
# ----------------------------------------------------------------------------
def source_activity_reference(x):
    n_chan, n_samples = x.shape
    n_segments = max(-(-(n_samples - SEGMENT_LENGTH) // HOP_LENGTH) + 1, 1)
    xf = x.astype(jnp.float32)
    segs = []
    for i in range(n_segments):
        start = i * HOP_LENGTH
        end = min(start + SEGMENT_LENGTH, n_samples)
        xseg = jnp.pad(xf[:, start:end],
                       ((0, 0), (0, SEGMENT_LENGTH - (end - start))),
                       constant_values=jnp.nan)
        segs.append(xseg)
    segments = jnp.stack(segs)                                # (S, C, SEG)
    chunks = segments.reshape(n_segments, n_chan, N_CHUNKS, CHUNK_SIZE)
    ce = jnp.mean(jnp.square(chunks), axis=(1, 3))
    ce = jnp.where(jnp.isnan(ce), 0.0, ce)
    ce = jnp.where(ce == 0.0, CHUNK_EPSILON, ce)
    thr = jnp.maximum(jnp.quantile(ce.reshape(-1), ENERGY_THRESHOLD_QUANTILE),
                      SEGMENT_EPSILON)
    prop = jnp.mean((ce > thr).astype(jnp.float32), axis=-1)
    sal = prop > SALIENT_PROPORTION_THRESHOLD
    seg_clean = jnp.where(jnp.isnan(segments), 0.0, segments)
    return ce, sal, seg_clean


# ----------------------------------------------------------------------------
# Demo
# ----------------------------------------------------------------------------
if __name__ == "__main__":
    key = jax.random.PRNGKey(0)
    n_chan, n_samples = 2, 7000        # -> 29 segments, 150 chunks, 2 grid tiles
    x = jax.random.normal(key, (n_chan, n_samples), dtype=jnp.float32)
    # Quiet region so the energy-threshold / salience logic is exercised.
    t = jnp.arange(n_samples)
    gate = jnp.where((t >= 2000) & (t < 4800), 1e-3, 1.0).astype(jnp.float32)
    x = x * gate[None, :]

    fwd = jax.jit(source_activity_forward)
    chunk_energies, salient = fwd(x)
    jax.block_until_ready((chunk_energies, salient))

    ce_ref, sal_ref, seg_ref = source_activity_reference(x)
    np.testing.assert_allclose(np.asarray(chunk_energies), np.asarray(ce_ref),
                               rtol=1e-5, atol=1e-12)
    np.testing.assert_array_equal(np.asarray(salient), np.asarray(sal_ref))

    # Save-path check: clean segments are host-side slices of the audio.
    x_np = np.asarray(x)
    n_segments = int(chunk_energies.shape[0])
    for i in (0, n_segments // 2, n_segments - 1):
        np.testing.assert_array_equal(extract_clean_segment(x_np, i),
                                      np.asarray(seg_ref[i]))
    # TODO(synk): pyloudnorm loudness normalization and np.save of the salient
    #             segments are host-side I/O and are omitted here.
    print("KERNEL_OK")
</pallas_src>

<mosaic_0001>
module attributes {stable_mosaic.version = 11 : i64} {
  func.func @_chunk_energy_kernel(%arg0: i32, %arg1: memref<2x16x384xf32, #tpu.memory_space<vmem>>, %arg2: memref<16x8xf32, #tpu.memory_space<vmem>>) attributes {dimension_semantics = [#tpu.dimension_semantics<parallel>], iteration_bounds = array<i64: 2>, scalar_prefetch = 0 : i64, scratch_operands = 0 : i64, tpu.core_type = #tpu.core_type<tc>, window_params = [{transform_indices = @transform_0, window_bounds = array<i64: 2, 16, 384>}, {transform_indices = @transform_1, window_bounds = array<i64: 16, 8>}]} {
    %c0 = arith.constant 0 : index
    %c0_0 = arith.constant 0 : index
    %c0_1 = arith.constant 0 : index
    %0 = vector.load %arg1[%c0, %c0_0, %c0_1] : memref<2x16x384xf32, #tpu.memory_space<vmem>>, vector<2x16x384xf32>
    %1 = arith.cmpf one, %0, %0 : vector<2x16x384xf32>
    %cst = arith.constant 0.000000e+00 : f32
    %2 = vector.broadcast %cst : f32 to vector<2x16x384xf32>
    %3 = arith.select %1, %2, %0 : vector<2x16x384xi1>, vector<2x16x384xf32>
    %4 = arith.mulf %3, %3 : vector<2x16x384xf32>
    %cst_2 = arith.constant dense<0.000000e+00> : vector<16x384xf32>
    %5 = vector.multi_reduction <add>, %4, %cst_2 [0] : vector<2x16x384xf32> to vector<16x384xf32>
    %6 = tpu.iota {dimensions = array<i32: 1>} : vector<16x8xi32>
    %7 = tpu.iota {dimensions = array<i32: 0>} : vector<16x8xi32>
    %cst_3 = arith.constant 0.000000e+00 : f32
    %8 = vector.broadcast %cst_3 : f32 to vector<16x8xf32>
    %9 = vector.extract_strided_slice %5 {offsets = [0, 0], sizes = [16, 48], strides = [1, 1]} : vector<16x384xf32> to vector<16x48xf32>
    %cst_4 = arith.constant dense<0.000000e+00> : vector<16xf32>
    %10 = vector.multi_reduction <add>, %9, %cst_4 [1] : vector<16x48xf32> to vector<16xf32>
    %11 = vector.shape_cast %10 : vector<16xf32> to vector<16x1xf32>
    %c0_i32 = arith.constant 0 : i32
    %12 = vector.broadcast %c0_i32 : i32 to vector<16x8xi32>
    %13 = arith.cmpi eq, %6, %12 : vector<16x8xi32>
    %cst_5 = arith.constant 0.000000e+00 : f32
    %14 = vector.shape_cast %11 : vector<16x1xf32> to vector<16x1xf32>
    %15 = vector.broadcast %14 : vector<16x1xf32> to vector<16x8xf32>
    %16 = vector.broadcast %cst_5 : f32 to vector<16x8xf32>
    %17 = arith.select %13, %15, %16 : vector<16x8xi1>, vector<16x8xf32>
    %18 = arith.addf %8, %17 : vector<16x8xf32>
    %19 = vector.extract_strided_slice %5 {offsets = [0, 48], sizes = [16, 48], strides = [1, 1]} : vector<16x384xf32> to vector<16x48xf32>
    %cst_6 = arith.constant dense<0.000000e+00> : vector<16xf32>
    %20 = vector.multi_reduction <add>, %19, %cst_6 [1] : vector<16x48xf32> to vector<16xf32>
    %21 = vector.shape_cast %20 : vector<16xf32> to vector<16x1xf32>
    %c1_i32 = arith.constant 1 : i32
    %22 = vector.broadcast %c1_i32 : i32 to vector<16x8xi32>
    %23 = arith.cmpi eq, %6, %22 : vector<16x8xi32>
    %cst_7 = arith.constant 0.000000e+00 : f32
    %24 = vector.shape_cast %21 : vector<16x1xf32> to vector<16x1xf32>
    %25 = vector.broadcast %24 : vector<16x1xf32> to vector<16x8xf32>
    %26 = vector.broadcast %cst_7 : f32 to vector<16x8xf32>
    %27 = arith.select %23, %25, %26 : vector<16x8xi1>, vector<16x8xf32>
    %28 = arith.addf %18, %27 : vector<16x8xf32>
    %29 = vector.extract_strided_slice %5 {offsets = [0, 96], sizes = [16, 48], strides = [1, 1]} : vector<16x384xf32> to vector<16x48xf32>
    %cst_8 = arith.constant dense<0.000000e+00> : vector<16xf32>
    %30 = vector.multi_reduction <add>, %29, %cst_8 [1] : vector<16x48xf32> to vector<16xf32>
    %31 = vector.shape_cast %30 : vector<16xf32> to vector<16x1xf32>
    %c2_i32 = arith.constant 2 : i32
    %32 = vector.broadcast %c2_i32 : i32 to vector<16x8xi32>
    %33 = arith.cmpi eq, %6, %32 : vector<16x8xi32>
    %cst_9 = arith.constant 0.000000e+00 : f32
    %34 = vector.shape_cast %31 : vector<16x1xf32> to vector<16x1xf32>
    %35 = vector.broadcast %34 : vector<16x1xf32> to vector<16x8xf32>
    %36 = vector.broadcast %cst_9 : f32 to vector<16x8xf32>
    %37 = arith.select %33, %35, %36 : vector<16x8xi1>, vector<16x8xf32>
    %38 = arith.addf %28, %37 : vector<16x8xf32>
    %39 = vector.extract_strided_slice %5 {offsets = [0, 144], sizes = [16, 48], strides = [1, 1]} : vector<16x384xf32> to vector<16x48xf32>
    %cst_10 = arith.constant dense<0.000000e+00> : vector<16xf32>
    %40 = vector.multi_reduction <add>, %39, %cst_10 [1] : vector<16x48xf32> to vector<16xf32>
    %41 = vector.shape_cast %40 : vector<16xf32> to vector<16x1xf32>
    %c3_i32 = arith.constant 3 : i32
    %42 = vector.broadcast %c3_i32 : i32 to vector<16x8xi32>
    %43 = arith.cmpi eq, %6, %42 : vector<16x8xi32>
    %cst_11 = arith.constant 0.000000e+00 : f32
    %44 = vector.shape_cast %41 : vector<16x1xf32> to vector<16x1xf32>
    %45 = vector.broadcast %44 : vector<16x1xf32> to vector<16x8xf32>
    %46 = vector.broadcast %cst_11 : f32 to vector<16x8xf32>
    %47 = arith.select %43, %45, %46 : vector<16x8xi1>, vector<16x8xf32>
    %48 = arith.addf %38, %47 : vector<16x8xf32>
    %49 = vector.extract_strided_slice %5 {offsets = [0, 192], sizes = [16, 48], strides = [1, 1]} : vector<16x384xf32> to vector<16x48xf32>
    %cst_12 = arith.constant dense<0.000000e+00> : vector<16xf32>
    %50 = vector.multi_reduction <add>, %49, %cst_12 [1] : vector<16x48xf32> to vector<16xf32>
    %51 = vector.shape_cast %50 : vector<16xf32> to vector<16x1xf32>
    %c4_i32 = arith.constant 4 : i32
    %52 = vector.broadcast %c4_i32 : i32 to vector<16x8xi32>
    %53 = arith.cmpi eq, %6, %52 : vector<16x8xi32>
    %cst_13 = arith.constant 0.000000e+00 : f32
    %54 = vector.shape_cast %51 : vector<16x1xf32> to vector<16x1xf32>
    %55 = vector.broadcast %54 : vector<16x1xf32> to vector<16x8xf32>
    %56 = vector.broadcast %cst_13 : f32 to vector<16x8xf32>
    %57 = arith.select %53, %55, %56 : vector<16x8xi1>, vector<16x8xf32>
    %58 = arith.addf %48, %57 : vector<16x8xf32>
    %59 = vector.extract_strided_slice %5 {offsets = [0, 240], sizes = [16, 48], strides = [1, 1]} : vector<16x384xf32> to vector<16x48xf32>
    %cst_14 = arith.constant dense<0.000000e+00> : vector<16xf32>
    %60 = vector.multi_reduction <add>, %59, %cst_14 [1] : vector<16x48xf32> to vector<16xf32>
    %61 = vector.shape_cast %60 : vector<16xf32> to vector<16x1xf32>
    %c5_i32 = arith.constant 5 : i32
    %62 = vector.broadcast %c5_i32 : i32 to vector<16x8xi32>
    %63 = arith.cmpi eq, %6, %62 : vector<16x8xi32>
    %cst_15 = arith.constant 0.000000e+00 : f32
    %64 = vector.shape_cast %61 : vector<16x1xf32> to vector<16x1xf32>
    %65 = vector.broadcast %64 : vector<16x1xf32> to vector<16x8xf32>
    %66 = vector.broadcast %cst_15 : f32 to vector<16x8xf32>
    %67 = arith.select %63, %65, %66 : vector<16x8xi1>, vector<16x8xf32>
    %68 = arith.addf %58, %67 : vector<16x8xf32>
    %69 = vector.extract_strided_slice %5 {offsets = [0, 288], sizes = [16, 48], strides = [1, 1]} : vector<16x384xf32> to vector<16x48xf32>
    %cst_16 = arith.constant dense<0.000000e+00> : vector<16xf32>
    %70 = vector.multi_reduction <add>, %69, %cst_16 [1] : vector<16x48xf32> to vector<16xf32>
    %71 = vector.shape_cast %70 : vector<16xf32> to vector<16x1xf32>
    %c6_i32 = arith.constant 6 : i32
    %72 = vector.broadcast %c6_i32 : i32 to vector<16x8xi32>
    %73 = arith.cmpi eq, %6, %72 : vector<16x8xi32>
    %cst_17 = arith.constant 0.000000e+00 : f32
    %74 = vector.shape_cast %71 : vector<16x1xf32> to vector<16x1xf32>
    %75 = vector.broadcast %74 : vector<16x1xf32> to vector<16x8xf32>
    %76 = vector.broadcast %cst_17 : f32 to vector<16x8xf32>
    %77 = arith.select %73, %75, %76 : vector<16x8xi1>, vector<16x8xf32>
    %78 = arith.addf %68, %77 : vector<16x8xf32>
    %79 = vector.extract_strided_slice %5 {offsets = [0, 336], sizes = [16, 48], strides = [1, 1]} : vector<16x384xf32> to vector<16x48xf32>
    %cst_18 = arith.constant dense<0.000000e+00> : vector<16xf32>
    %80 = vector.multi_reduction <add>, %79, %cst_18 [1] : vector<16x48xf32> to vector<16xf32>
    %81 = vector.shape_cast %80 : vector<16xf32> to vector<16x1xf32>
    %c7_i32 = arith.constant 7 : i32
    %82 = vector.broadcast %c7_i32 : i32 to vector<16x8xi32>
    %83 = arith.cmpi eq, %6, %82 : vector<16x8xi32>
    %cst_19 = arith.constant 0.000000e+00 : f32
    %84 = vector.shape_cast %81 : vector<16x1xf32> to vector<16x1xf32>
    %85 = vector.broadcast %84 : vector<16x1xf32> to vector<16x8xf32>
    %86 = vector.broadcast %cst_19 : f32 to vector<16x8xf32>
    %87 = arith.select %83, %85, %86 : vector<16x8xi1>, vector<16x8xf32>
    %88 = arith.addf %78, %87 : vector<16x8xf32>
    %cst_20 = arith.constant 0.010416667 : f32
    %89 = vector.broadcast %cst_20 : f32 to vector<16x8xf32>
    %90 = arith.mulf %88, %89 : vector<16x8xf32>
    %c16_i32 = arith.constant 16 : i32
    %91 = arith.muli %arg0, %c16_i32 : i32
    %92 = vector.broadcast %91 : i32 to vector<16x8xi32>
    %93 = arith.addi %7, %92 : vector<16x8xi32>
    %c8_i32 = arith.constant 8 : i32
    %94 = vector.broadcast %c8_i32 : i32 to vector<16x8xi32>
    %95 = arith.muli %93, %94 : vector<16x8xi32>
    %96 = arith.addi %95, %6 : vector<16x8xi32>
    %c1_i32_21 = arith.constant 1 : i32
    %97 = vector.broadcast %c1_i32_21 : i32 to vector<16x8xi32>
    %98 = arith.addi %96, %97 : vector<16x8xi32>
    %c48_i32 = arith.constant 48 : i32
    %99 = vector.broadcast %c48_i32 : i32 to vector<16x8xi32>
    %100 = arith.muli %98, %99 : vector<16x8xi32>
    %c7000_i32 = arith.constant 7000 : i32
    %101 = vector.broadcast %c7000_i32 : i32 to vector<16x8xi32>
    %102 = arith.cmpi sgt, %100, %101 : vector<16x8xi32>
    %cst_22 = arith.constant 0.000000e+00 : f32
    %103 = vector.broadcast %cst_22 : f32 to vector<16x8xf32>
    %104 = arith.cmpf oeq, %90, %103 : vector<16x8xf32>
    %105 = arith.ori %102, %104 : vector<16x8xi1>
    %cst_23 = arith.constant 9.99999974E-6 : f32
    %106 = vector.broadcast %cst_23 : f32 to vector<16x8xf32>
    %107 = arith.select %105, %106, %90 : vector<16x8xi1>, vector<16x8xf32>
    %c0_24 = arith.constant 0 : index
    %c0_25 = arith.constant 0 : index
    %108 = vector.load %arg2[%c0_24, %c0_25] : memref<16x8xf32, #tpu.memory_space<vmem>>, vector<16x8xf32>
    tpu.vector_store %arg2[%c0_24, %c0_25], %107 {strides = array<i32>} : memref<16x8xf32, #tpu.memory_space<vmem>>, vector<16x8xf32>,
    return
  }
  func.func @transform_0(%arg0: i32) -> (i32, i32, i32) {
    %c0_i32 = arith.constant 0 : i32
    %c0_i32_0 = arith.constant 0 : i32
    %c0_i32_1 = arith.constant 0 : i32
    return %c0_i32, %arg0, %c0_i32_0 : i32, i32, i32
  }
  func.func @transform_1(%arg0: i32) -> (i32, i32) {
    %c0_i32 = arith.constant 0 : i32
    %c0_i32_0 = arith.constant 0 : i32
    return %arg0, %c0_i32 : i32, i32
  }
}

</mosaic_0001>

<bundles_post_ra>
// kernel: source_activity_forward.2
= control target key start
LH: loop header
LB: loop body
LE: loop exit
PB: predicated region body
PF: predicated region fallthrough
CT: control target
= control target key end

     0   :  { %s548_s6 = smov 0   ;;  %s649_s0 = inlined_call_operand.vmem [shape: f32[1,2,32,384], index: 0, kind: input, shape index: {}]   ;;  %s650_s1 = inlined_call_operand.vmem [shape: f32[32,8], index: 1, kind: output, shape index: {}]  }
   0x1 LB: > { %s484_s7 = sadd.s32 4294967295, %s529_s6   ;;  %p488_p0 = scmp.ge.s32.totalorder %s529_s6, 1  ;;  %s529_s6 = sphi %s548_s6, %s11_s6  }
   0x2   : > { %p89_p1 = scmp.lt.s32.totalorder %s529_s6, 3 }
   0x4   : > { %p90_p2 = pnand %p488_p0, %p89_p1 }
   0x5   : > { %s489_s8 = sshll.u32 (!%p90_p2), %s484_s7, 1  ;;  %s531_s13 = smov (!%p90_p2), 80  }
   0x6   : > { %93 = sbr.rel (%p90_p2) target bundleno = 362 (0x16a), region = 24  ;;  %p111_p3 = scmp.lt.s32.totalorder (!%p90_p2), %s489_s8, 3 }
   0x7   : > { %s532_s14 = smov (!%p90_p2), 112   ;;  %s533_s15 = smov (!%p90_p2), 16  }
   0x8   : > { %s534_s16 = smov (!%p90_p2), 48   ;;  %s535_s17 = smov (!%p90_p2), 32  }
   0x9   : > { %s536_s18 = smov (!%p90_p2), 64   ;;  %s537_s19 = smov (!%p90_p2), 96  }
   0xa   : > { %s504_s20 = sshll.u32 (!%p90_p2), %s484_s7, 4 }
   0xb   : > { %s652_s8 = smov (!%p111_p3, %s489_s8), 3  ;;  %vm252_vm4 = vcmask 392192   ;;  %vm293_vm13 = vcmask 261120   ;;  %vm353_vm14 = vcmask 130048  }
   0xc   : > { %s507_s9 = smul.u32 24, %s652_s8  ;;  %s492_s21 = sshll.u32 %s652_s8, 3 }
   0xd   : > { %s121_s24 = scalar_lea.vmem %s650_s1, %s492_s21 }
   0xe   : > { %s564_s12 = scalar_lea.vmem %s649_s0, %s507_s9 }
   0xf   : > { %v123_v0 = vld [vmem:[%s564_s12] sm:$0xff]  ;;  %v495_v2 = vld [vmem:[%s564_s12 + $0x18] sm:$0xff]  ;;  %v493_v4 = vld [vmem:[%s564_s12 + $0x8] sm:$0xff] }
  0x10   : > { %v498_v1 = vld [vmem:[%s564_s12 + $0x60] sm:$0xff]  ;;  %vm205_vm0 = vcmp.ne.f32.partialorder %v123_v0, %v123_v0  ;;  %v501_v3 = vld [vmem:[%s564_s12 + $0x78] sm:$0xff]  ;;  %vm208_vm2 = vcmp.ne.f32.partialorder %v495_v2, %v495_v2  ;;  %v499_v5 = vld [vmem:[%s564_s12 + $0x68] sm:$0xff]  ;;  %vm206_vm5 = vcmp.ne.f32.partialorder %v493_v4, %v493_v4 }
  0x11   : > { %vm211_vm1 = vcmp.ne.f32.partialorder %v498_v1, %v498_v1  ;;  %v217_v6 = vsel %vm205_vm0, 0.0, %v123_v0  ;;  %vm214_vm3 = vcmp.ne.f32.partialorder %v501_v3, %v501_v3  ;;  %v220_v8 = vsel %vm208_vm2, 0.0, %v495_v2  ;;  %v496_v13 = vld [vmem:[%s564_s12 + $0x20] sm:$0xff]  ;;  %v494_v20 = vld [vmem:[%s564_s12 + $0x10] sm:$0xff]  ;;  %v497_v37 = vld [vmem:[%s564_s12 + $0x28] sm:$0xff] }
  0x12   : > { %v223_v7 = vsel %vm211_vm1, 0.0, %v498_v1  ;;  %v229_v9 = vmul.f32 %v217_v6, %v217_v6  ;;  %v226_v11 = vsel %vm214_vm3, 0.0, %v501_v3  ;;  %v232_v12 = vmul.f32 %v220_v8, %v220_v8  ;;  %v502_v15 = vld [vmem:[%s564_s12 + $0x80] sm:$0xff]  ;;  %v500_v21 = vld [vmem:[%s564_s12 + $0x70] sm:$0xff]  ;;  %v503_v38 = vld [vmem:[%s564_s12 + $0x88] sm:$0xff] }
  0x13   : > { %v235_v10 = vmul.f32 %v223_v7, %v223_v7  ;;  %v238_v14 = vmul.f32 %v226_v11, %v226_v11  ;;  %vm212_vm6 = vcmp.ne.f32.partialorder %v499_v5, %v499_v5  ;;  %v218_v17 = vsel %vm206_vm5, 0.0, %v493_v4 }
  0x14   : > { %v224_v18 = vsel %vm212_vm6, 0.0, %v499_v5  ;;  %vm209_vm7 = vcmp.ne.f32.partialorder %v496_v13, %v496_v13  ;;  %v230_v23 = vmul.f32 %v218_v17, %v218_v17  ;;  %vm215_vm8 = vcmp.ne.f32.partialorder %v502_v15, %v502_v15 }
  0x15   : > { %v241_v16 = vadd.f32 %v235_v10, %v229_v9  ;;  %v244_v19 = vadd.f32 %v238_v14, %v232_v12  ;;  %v236_v24 = vmul.f32 %v224_v18, %v224_v18  ;;  %vm207_vm9 = vcmp.ne.f32.partialorder %v494_v20, %v494_v20 }
  0x16   : > { %vm213_vm10 = vcmp.ne.f32.partialorder %v500_v21, %v500_v21  ;;  %v221_v26 = vsel %vm209_vm7, 0.0, %v496_v13  ;;  %v227_v27 = vsel %vm215_vm8, 0.0, %v502_v15  ;;  %v219_v29 = vsel %vm207_vm9, 0.0, %v494_v20 }
  0x17   : > { %266 = vrot.lane.b32.xlu1 %v241_v16, %s531_s13  ;;  %v253_v22 = vsel %vm252_vm4, %v241_v16, 0.0  ;;  %v256_v25 = vsel %vm252_vm4, %v244_v19, 0.0  ;;  %v242_v28 = vadd.f32 %v236_v24, %v230_v23  ;;  %v225_v30 = vsel %vm213_vm10, 0.0, %v500_v21 }
  0x18   : > { %254 = vadd.xlane.f32.xlu0 %v253_v22  ;;  %v233_v31 = vmul.f32 %v221_v26, %v221_v26  ;;  %v239_v32 = vmul.f32 %v227_v27, %v227_v27  ;;  %v231_v33 = vmul.f32 %v219_v29, %v219_v29  ;;  %v237_v34 = vmul.f32 %v225_v30, %v225_v30 }
  0x19   : > { %vm210_vm11 = vcmp.ne.f32.partialorder %v497_v37, %v497_v37  ;;  %vm216_vm12 = vcmp.ne.f32.partialorder %v503_v38, %v503_v38  ;;  %v247_v21 = vlaneseq  ;;  %v406_v26 = vstv %s504_s20 }
  0x1a   : > { %v245_v35 = vadd.f32 %v239_v32, %v233_v31  ;;  %v243_v36 = vadd.f32 %v237_v34, %v231_v33  ;;  %v222_v39 = vsel %vm210_vm11, 0.0, %v497_v37  ;;  %v228_v40 = vsel %vm216_vm12, 0.0, %v503_v38 }
  0x1b   : > { %268 = vrot.lane.b32.xlu1 %v244_v19, %s531_s13  ;;  %v234_v41 = vmul.f32 %v222_v39, %v222_v39  ;;  %v240_v42 = vmul.f32 %v228_v40, %v228_v40  ;;  %v600_v23 = vand.u32 127, %v247_v21  ;;  %vm425_vm8 = vcmask 64512  }
  0x1c   : > { %257 = vadd.xlane.f32.xlu0 %v256_v25  ;;  %v250_v25 = vshrl.u32 %v247_v21, 7 }
  0x1d   : > { %v246_v43 = vadd.f32 %v240_v42, %v234_v41  ;;  %vm278_vm15 = vcmp.eq.s32.totalorder %v600_v23, 1  ;;  %vm259_vm0 = vcmp.eq.s32.totalorder %v600_v23, 0  ;;  %vm304_vm1 = vcmp.eq.s32.totalorder %v600_v23, 2 }
  0x1e   : > { %v251_v29 = vadd.s32 8, %v250_v25  ;;  %vm321_vm2 = vcmp.eq.s32.totalorder %v600_v23, 3  ;;  %vm338_vm3 = vcmp.eq.s32.totalorder %v600_v23, 4  ;;  %vm381_vm5 = vcmp.eq.s32.totalorder %v600_v23, 6 }
  0x1f   : > { %309 = vrot.lane.b32.xlu1 %v242_v28, %s532_s14  ;;  %vm398_vm6 = vcmp.eq.s32.totalorder %v600_v23, 7 }
  0x23   : > { %311 = vrot.lane.b32.xlu1 %v245_v35, %s532_s14 }
  0x27   : > { %347 = vrot.lane.b32.xlu1 %v243_v36, %s533_s15 }
  0x2b   : > { %386 = vrot.lane.b32.xlu1 %v243_v36, %s534_s16 }
  0x32   : > { %285 = vrot.lane.b32.xlu0 %v241_v16, %s535_s17 }
  0x36   : > { %287 = vrot.lane.b32.xlu0 %v242_v28, %s535_s17 }
  0x3a   : > { %289 = vrot.lane.b32.xlu0 %v244_v19, %s535_s17 }
  0x3e   : > { %291 = vrot.lane.b32.xlu0 %v245_v35, %s535_s17 }
  0x42   : > { %326 = vrot.lane.b32.xlu0 %v242_v28, %s536_s18 }
  0x46   : > { %328 = vrot.lane.b32.xlu0 %v245_v35, %s536_s18 }
  0x4a   : > { %345 = vrot.lane.b32.xlu0 %v242_v28, %s533_s15  ;;  %v407_v28 = vadd.s32 %v406_v26, %v250_v25 }
  0x4e   : > { %349 = vrot.lane.b32.xlu0 %v245_v35, %s533_s15  ;;  %v409_v35 = vmul.u32 8, %v407_v28 }
  0x52   : > { %351 = vrot.lane.b32.xlu0 %v246_v43, %s533_s15 }
  0x56   : > { %369 = vrot.lane.b32.xlu0 %v243_v36, %s537_s19  ;;  %v408_v36 = vadd.s32 %v406_v26, %v251_v29 }
  0x5a   : > { %371 = vrot.lane.b32.xlu0 %v246_v43, %s537_s19 }
  0x5e   : > { %388 = vrot.lane.b32.xlu0 %v246_v43, %s534_s16 }
  0x89   : > { %v267_v44 = vpop.permute.xlu1 %266 }
  0x8a   : > { %v272_v45 = vsel %vm252_vm4, %v267_v44, 0.0 }
  0x8b   : > { %273 = vadd.xlane.f32.xlu0 %v272_v45  ;;  %v411_v45 = vadd.s32 %v409_v35, %v600_v23 }
  0x8d   : > { %v269_v46 = vpop.permute.xlu1 %268 }
  0x8e   : > { %v275_v47 = vsel %vm252_vm4, %v269_v46, 0.0  ;;  %v410_v46 = vmul.u32 8, %v408_v36 }
  0x8f   : > { %276 = vadd.xlane.f32.xlu1 %v275_v47 }
  0x91   : > { %v310_v48 = vpop.permute.xlu1 %309 }
  0x92   : > { %v315_v49 = vsel %vm252_vm4, %v310_v48, 0.0 }
  0x93   : > { %316 = vadd.xlane.f32.xlu1 %v315_v49 }
  0x95   : > { %v312_v55 = vpop.permute.xlu1 %311 }
  0x96   : > { %v318_v58 = vsel %vm252_vm4, %v312_v55, 0.0  ;;  %v413_v55 = vadd.s32 1, %v411_v45 }
  0x99   : > { %v348_v2 = vpop.permute.xlu1 %347 }
  0x9d   : > { %v387_v11 = vpop.permute.xlu1 %386 }
  0x9e   : > { %v392_v13 = vsel %vm252_vm4, %v387_v11, 0.0 }
  0xa1   : > { %v583_v50 = vpop.xlane.xlu0 %254 }
  0xa2   : > { %v260_v32 = vsel %vm259_vm0, %v583_v50, 0.0 }
  0xa5   : > { %v585_v51 = vpop.xlane.xlu0 %257 }
  0xa6   : > { %v261_v39 = vsel %vm259_vm0, %v585_v51, 0.0 }
  0xa9   : > { %v286_v52 = vpop.permute.xlu0 %285 }
  0xad   : > { %v288_v53 = vpop.permute.xlu0 %287 }
  0xae   : > { %v294_v54 = vsel %vm293_vm13, %v286_v52, %v288_v53 }
  0xaf   : > { %v298_v56 = vsel %vm252_vm4, %v294_v54, 0.0 }
  0xb0   : > { %299 = vadd.xlane.f32.xlu1 %v298_v56  ;;  %v412_v56 = vadd.s32 %v410_v46, %v600_v23 }
  0xb1   : > { %v290_v57 = vpop.permute.xlu0 %289 }
  0xb4   : > { %319 = vadd.xlane.f32.xlu1 %v318_v58 }
  0xb5   : > { %v292_v59 = vpop.permute.xlu0 %291 }
  0xb6   : > { %v295_v60 = vsel %vm293_vm13, %v290_v57, %v292_v59 }
  0xb7   : > { %v301_v61 = vsel %vm252_vm4, %v295_v60, 0.0 }
  0xb8   : > { %302 = vadd.xlane.f32.xlu0 %v301_v61 }
  0xb9   : > { %v327_v62 = vpop.permute.xlu0 %326 }
  0xba   : > { %v332_v63 = vsel %vm252_vm4, %v327_v62, 0.0 }
  0xbc   : > { %333 = vadd.xlane.f32.xlu0 %v332_v63 }
  0xbd   : > { %v329_v0 = vpop.permute.xlu0 %328 }
  0xbe   : > { %v335_v1 = vsel %vm252_vm4, %v329_v0, 0.0 }
  0xc0   : > { %336 = vadd.xlane.f32.xlu0 %v335_v1  ;;  %v415_v1 = vmul.u32 48, %v413_v55 }
  0xc1   : > { %v346_v3 = vpop.permute.xlu0 %345 }
  0xc2   : > { %v354_v4 = vsel %vm353_vm14, %v346_v3, %v348_v2  ;;  %v414_v3 = vadd.s32 1, %v412_v56  ;;  %vm417_vm7 = vcmp.gt.s32.totalorder %v415_v1, 7000 }
  0xc3   : > { %v358_v5 = vsel %vm252_vm4, %v354_v4, 0.0 }
  0xc4   : > { %359 = vadd.xlane.f32.xlu0 %v358_v5 }
  0xc5   : > { %v350_v6 = vpop.permute.xlu0 %349 }
  0xc9   : > { %v352_v7 = vpop.permute.xlu0 %351 }
  0xca   : > { %v355_v8 = vsel %vm353_vm14, %v350_v6, %v352_v7 }
  0xcb   : > { %v361_v9 = vsel %vm252_vm4, %v355_v8, 0.0 }
  0xcc   : > { %362 = vadd.xlane.f32.xlu1 %v361_v9 }
  0xcd   : > { %v370_v10 = vpop.permute.xlu0 %369 }
  0xce   : > { %v375_v12 = vsel %vm252_vm4, %v370_v10, 0.0  ;;  %v416_v10 = vmul.u32 48, %v414_v3 }
  0xcf   : > { %376 = vadd.xlane.f32.xlu0 %v375_v12 }
  0xd0   : > { %vm418_vm11 = vcmp.gt.s32.totalorder %v416_v10, 7000 }
  0xd1   : > { %v372_v14 = vpop.permute.xlu0 %371 }
  0xd2   : > { %v378_v15 = vsel %vm252_vm4, %v372_v14, 0.0 }
  0xd3   : > { %393 = vadd.xlane.f32.xlu0 %v392_v13  ;;  %379 = vadd.xlane.f32.xlu1 %v378_v15 }
  0xd5   : > { %v389_v16 = vpop.permute.xlu0 %388 }
  0xd6   : > { %v395_v17 = vsel %vm252_vm4, %v389_v16, 0.0  ;;  %vm364_vm4 = vcmp.eq.s32.totalorder %v600_v23, 5 }
  0xd7   : > { %396 = vadd.xlane.f32.xlu1 %v395_v17 }
 0x114   : > { %v274_v18 = vpop.xlane.xlu0 %273 }
 0x115   : > { %v279_v30 = vsel %vm278_vm15, %v274_v18, 0.0 }
 0x116   : > { %v281_v34 = vadd.f32 %v279_v30, %v260_v32 }
 0x118   : > { %v277_v19 = vpop.xlane.xlu1 %276 }
 0x119   : > { %v280_v37 = vsel %vm278_vm15, %v277_v19, 0.0 }
 0x11a   : > { %v282_v42 = vadd.f32 %v280_v37, %v261_v39 }
 0x11c   : > { %v317_v22 = vpop.xlane.xlu1 %316 }
 0x11d   : > { %v322_v40 = vsel %vm321_vm2, %v317_v22, 0.0 }
 0x139   : > { %v300_v27 = vpop.xlane.xlu1 %299 }
 0x13a   : > { %v305_v33 = vsel %vm304_vm1, %v300_v27, 0.0 }
 0x13b   : > { %v307_v38 = vadd.f32 %v305_v33, %v281_v34 }
 0x13d   : > { %v320_v43 = vpop.xlane.xlu1 %319  ;;  %v324_v49 = vadd.f32 %v322_v40, %v307_v38 }
 0x13e   : > { %v323_v50 = vsel %vm321_vm2, %v320_v43, 0.0 }
 0x141   : > { %v303_v20 = vpop.xlane.xlu0 %302 }
 0x142   : > { %v306_v41 = vsel %vm304_vm1, %v303_v20, 0.0 }
 0x143   : > { %v308_v48 = vadd.f32 %v306_v41, %v282_v42 }
 0x145   : > { %v334_v24 = vpop.xlane.xlu0 %333  ;;  %v325_v59 = vadd.f32 %v323_v50, %v308_v48 }
 0x146   : > { %v339_v47 = vsel %vm338_vm3, %v334_v24, 0.0 }
 0x147   : > { %v341_v52 = vadd.f32 %v339_v47, %v324_v49 }
 0x149   : > { %v337_v31 = vpop.xlane.xlu0 %336 }
 0x14a   : > { %v340_v57 = vsel %vm338_vm3, %v337_v31, 0.0 }
 0x14b   : > { %v342_v62 = vadd.f32 %v340_v57, %v325_v59 }
 0x14d   : > { %v360_v44 = vpop.xlane.xlu0 %359 }
 0x14e   : > { %v365_v51 = vsel %vm364_vm4, %v360_v44, 0.0 }
 0x14f   : > { %v367_v60 = vadd.f32 %v365_v51, %v341_v52 }
 0x155   : > { %v363_v53 = vpop.xlane.xlu1 %362 }
 0x156   : > { %v366_v61 = vsel %vm364_vm4, %v363_v53, 0.0 }
 0x157   : > { %v368_v6 = vadd.f32 %v366_v61, %v342_v62 }
 0x158   : > { %v377_v54 = vpop.xlane.xlu0 %376 }
 0x159   : > { %v382_v58 = vsel %vm381_vm5, %v377_v54, 0.0 }
 0x15a   : > { %v384_v63 = vadd.f32 %v382_v58, %v367_v60 }
 0x15c   : > { %v380_v0 = vpop.xlane.xlu1 %379  ;;  %v394_v2 = vpop.xlane.xlu0 %393 }
 0x15d   : > { %v383_v4 = vsel %vm381_vm5, %v380_v0, 0.0  ;;  %v399_v5 = vsel %vm398_vm6, %v394_v2, 0.0 }
 0x15e   : > { %v401_v7 = vadd.f32 %v399_v5, %v384_v63  ;;  %v385_v8 = vadd.f32 %v383_v4, %v368_v6 }
 0x160   : > { %v403_v9 = vmul.f32 0.010416667, %v401_v7  ;;  %v397_v11 = vpop.xlane.xlu1 %396 }
 0x161   : > { %v400_v12 = vsel %vm398_vm6, %v397_v11, 0.0 }
 0x162   : > { %vm419_vm9 = vcmp.eq.f32.partialorder %v403_v9, 0.0  ;;  %v402_v13 = vadd.f32 %v400_v12, %v385_v8 }
 0x163   : > { %vm421_vm10 = vmor %vm417_vm7, %vm419_vm9 }
 0x164   : > { %v423_v14 = vsel %vm421_vm10, 1e-05, %v403_v9  ;;  %v404_v15 = vmul.f32 0.010416667, %v402_v13 }
 0x165   : > { %426 = vst.msk [vmem:[%s121_s24] sm:$0xff] %vm425_vm8, %v423_v14 }
 0x166   : > { %vm420_vm12 = vcmp.eq.f32.partialorder %v404_v15, 0.0 }
 0x167   : > { %vm422_vm13 = vmor %vm418_vm11, %vm420_vm12 }
 0x168   : > { %v424_v16 = vsel %vm422_vm13, 1e-05, %v404_v15 }
 0x169   : > { %427 = vst.msk [vmem:[%s121_s24 + $0x8] sm:$0xff] %vm425_vm8, %v424_v16 }
 0x16a PF: > { %s11_s6 = sadd.s32 1, %s529_s6  }
 0x16b   : > { %p8_p4 = scmp.ge.s32.totalorder %s11_s6, 4  }
 0x16d   :  { %10 = sbr.rel (!%p8_p4) target bundleno = 1 (0x1), region = 76 }

</bundles_post_ra>
